<compile_context>
chip_gen: v7x
topology: tpu7x:2x2x1
jax: 0.10.0
libtpu: 0.0.40
codegen_flags: <defaults>
</compile_context>

<pallas_src>
import functools

import jax
import jax.numpy as jnp
from jax.experimental import pallas as pl
from jax.experimental.pallas import tpu as pltpu


def _erf(x):
    # Abramowitz & Stegun 7.1.26 rational approximation (max abs err ~1.5e-7),
    # built from ops Mosaic lowers cleanly (mul/add/exp/reciprocal/select).
    a1, a2, a3, a4, a5 = 0.254829592, -0.284496736, 1.421413741, -1.453152027, 1.061405429
    p = 0.3275911
    ax = jnp.abs(x)
    d = 1.0 + p * ax
    # EUP approximate reciprocal (off the saturated VALU slot) + one Newton
    # step so the result holds f32 accuracy on every TPU generation.
    t = pl.reciprocal(d, approx=True)
    t = t * (2.0 - d * t)
    poly = ((((a5 * t + a4) * t + a3) * t + a2) * t + a1) * t
    y = 1.0 - poly * jnp.exp(-ax * ax)
    return jnp.where(x >= 0.0, y, -y)


def _gelu_exact(x):
    # GELU(x) = 0.5 * x * (1 + erf(x / sqrt(2)))   (torch.nn.GELU default).
    return 0.5 * x * (1.0 + _erf(x * 0.7071067811865476))


def _mlp_kernel(x_ref, w1_ref, b1_ref, w2_ref, b2_ref, w3_ref, b3_ref, o_ref):
    # Transposed layout: columns are batch samples (lane axis).
    x = x_ref[...].astype(jnp.float32)                                                # (F_in, bb)

    h = jnp.dot(w1_ref[...], x, preferred_element_type=jnp.float32) + b1_ref[...]     # (H, bb)
    h = _gelu_exact(h)

    h = jnp.dot(w2_ref[...], h, preferred_element_type=jnp.float32) + b2_ref[...]     # (H, bb)
    h = _gelu_exact(h)

    out = jnp.dot(w3_ref[...], h, preferred_element_type=jnp.float32) + b3_ref[...]   # (F_out, bb)
    o_ref[...] = out.astype(o_ref.dtype)


def _round_up(n, m):
    return ((n + m - 1) // m) * m


@functools.partial(jax.jit, static_argnames=("block_b",))
def net_forward(x, params, block_b=4096):
    """Pallas implementation of Net.forward.  x: (B, 2) float32 -> (B, 1)."""
    w1, b1, w2, b2, w3, b3 = params          # PyTorch layout: W (out, in), b (out, 1)
    B, F_in = x.shape
    H = w1.shape[0]                          # 64
    F_out = w3.shape[0]                      # 1

    # Batch tile: forced multiple of 128 (lane-dense, BlockSpec-legal), large
    # to amortize per-grid-step overhead, but capped at ~ceil(B/2) so the grid
    # keeps >= 2 parallel steps for mid-size batches (both v7x cores busy).
    block_b = max(128, _round_up(block_b, 128))
    half = max(128, _round_up((B + 1) // 2, 128))
    bb = min(block_b, half)
    Bp = _round_up(B, bb)                    # padded batch

    # Batch on the lane axis; pad only the tail (no zeros+set full rewrite).
    xt = x.T                                 # (F_in, B)
    if Bp != B:
        xt = jnp.pad(xt, ((0, 0), (0, Bp - B)))

    grid = (Bp // bb,)

    def full(shape):
        # Full (untiled) block with a constant index -> resident across steps.
        return pl.BlockSpec(shape, lambda i: tuple(0 for _ in shape))

    out_t = pl.pallas_call(
        _mlp_kernel,
        out_shape=jax.ShapeDtypeStruct((F_out, Bp), x.dtype),
        grid_spec=pl.GridSpec(
            grid=grid,
            in_specs=[
                pl.BlockSpec((F_in, bb), lambda i: (0, i)),   # x.T tile (lane-dense)
                full((H, F_in)),                              # w1
                full((H, 1)),                                 # b1 (broadcast over lanes)
                full((H, H)),                                 # w2
                full((H, 1)),                                 # b2
                full((F_out, H)),                             # w3
                full((F_out, 1)),                             # b3
            ],
            out_specs=pl.BlockSpec((F_out, bb), lambda i: (0, i)),
        ),
        compiler_params=pltpu.CompilerParams(
            dimension_semantics=("parallel",),
            # Headroom for block_b up to ~8192 even under v5e's 16 MiB scoped
            # default; well below v7x's 64 MiB physical VMEM.
            vmem_limit_bytes=32 * 1024 * 1024,
        ),
    )(xt, w1, b1, w2, b2, w3, b3)

    return out_t[:, :B].T                     # (B, F_out)


def init_params(key):
    """Deterministic init matching nn.Linear: W (out, in), b stored as (out, 1)."""
    def linear(key, fan_in, fan_out):
        kw, kb = jax.random.split(key)
        bound = 1.0 / (fan_in ** 0.5)
        w = jax.random.uniform(kw, (fan_out, fan_in), jnp.float32, -bound, bound)
        b = jax.random.uniform(kb, (fan_out, 1), jnp.float32, -bound, bound)
        return w, b

    k1, k2, k3 = jax.random.split(key, 3)
    w1, b1 = linear(k1, 2, 64)    # layer1: Linear(2, 64)
    w2, b2 = linear(k2, 64, 64)   # layer2: Linear(64, 64)
    w3, b3 = linear(k3, 64, 1)    # layer3: Linear(64, 1)
    return (w1, b1, w2, b2, w3, b3)


def net_forward_ref(x, params):
    w1, b1, w2, b2, w3, b3 = params
    h = jax.nn.gelu(x @ w1.T + b1.T, approximate=False)
    h = jax.nn.gelu(h @ w2.T + b2.T, approximate=False)
    return h @ w3.T + b3.T


if __name__ == "__main__":
    key = jax.random.PRNGKey(0)
    kp, kx = jax.random.split(key)

    params = init_params(kp)

    # Small case, matching the module's Linear(2, ...) input.
    x = jax.random.normal(kx, (8, 2), jnp.float32)
    out = jax.block_until_ready(net_forward(x, params))
    ref = net_forward_ref(x, params)
    assert out.shape == (8, 1), out.shape
    assert jnp.allclose(out, ref, atol=1e-5, rtol=1e-5), (out, ref)

    # Non-multiple batch exercises the padding path and a 2-step parallel grid
    # (bb is capped at ceil(B/2) rounded to 128 -> 512 here).
    x2 = jax.random.normal(kx, (1000, 2), jnp.float32)
    out2 = jax.block_until_ready(net_forward(x2, params))
    ref2 = net_forward_ref(x2, params)
    assert out2.shape == (1000, 1), out2.shape
    assert jnp.allclose(out2, ref2, atol=1e-5, rtol=1e-5)

    print("KERNEL_OK")
</pallas_src>

<mosaic_0001>
module attributes {stable_mosaic.version = 11 : i64} {
  func.func @_mlp_kernel(%arg0: i32, %arg1: memref<2x128xf32, #tpu.memory_space<vmem>>, %arg2: memref<64x2xf32, #tpu.memory_space<vmem>>, %arg3: memref<64x1xf32, #tpu.memory_space<vmem>>, %arg4: memref<64x64xf32, #tpu.memory_space<vmem>>, %arg5: memref<64x1xf32, #tpu.memory_space<vmem>>, %arg6: memref<1x64xf32, #tpu.memory_space<vmem>>, %arg7: memref<1x1xf32, #tpu.memory_space<vmem>>, %arg8: memref<1x128xf32, #tpu.memory_space<vmem>>) attributes {dimension_semantics = [#tpu.dimension_semantics<parallel>], iteration_bounds = array<i64: 1>, scalar_prefetch = 0 : i64, scratch_operands = 0 : i64, tpu.core_type = #tpu.core_type<tc>, window_params = [{transform_indices = @transform_0, window_bounds = array<i64: 2, 128>}, {pipeline_mode = #tpu.pipeline_mode<synchronous>, transform_indices = @transform_1, window_bounds = array<i64: 64, 2>}, {pipeline_mode = #tpu.pipeline_mode<synchronous>, transform_indices = @transform_2, window_bounds = array<i64: 64, 1>}, {pipeline_mode = #tpu.pipeline_mode<synchronous>, transform_indices = @transform_3, window_bounds = array<i64: 64, 64>}, {pipeline_mode = #tpu.pipeline_mode<synchronous>, transform_indices = @transform_4, window_bounds = array<i64: 64, 1>}, {pipeline_mode = #tpu.pipeline_mode<synchronous>, transform_indices = @transform_5, window_bounds = array<i64: 1, 64>}, {pipeline_mode = #tpu.pipeline_mode<synchronous>, transform_indices = @transform_6, window_bounds = array<i64: 1, 1>}, {transform_indices = @transform_7, window_bounds = array<i64: 1, 128>}]} {
    %c0 = arith.constant 0 : index
    %c0_0 = arith.constant 0 : index
    %0 = vector.load %arg1[%c0, %c0_0] : memref<2x128xf32, #tpu.memory_space<vmem>>, vector<2x128xf32>
    %c0_1 = arith.constant 0 : index
    %c0_2 = arith.constant 0 : index
    %1 = vector.load %arg2[%c0_1, %c0_2] : memref<64x2xf32, #tpu.memory_space<vmem>>, vector<64x2xf32>
    %cst = arith.constant dense<0.000000e+00> : vector<64x128xf32>
    %2 = tpu.matmul %1, %0, %cst {dimension_numbers = #tpu.dot_dimension_numbers<[1], [0], [0], [1], [0, 0, 1, 1], [], []>} : vector<64x2xf32>, vector<2x128xf32>, vector<64x128xf32> -> vector<64x128xf32>
    %c0_3 = arith.constant 0 : index
    %c0_4 = arith.constant 0 : index
    %3 = vector.load %arg3[%c0_3, %c0_4] : memref<64x1xf32, #tpu.memory_space<vmem>>, vector<64x1xf32>
    %4 = vector.broadcast %3 : vector<64x1xf32> to vector<64x128xf32>
    %5 = arith.addf %2, %4 : vector<64x128xf32>
    %cst_5 = arith.constant 5.000000e-01 : f32
    %6 = vector.broadcast %cst_5 : f32 to vector<64x128xf32>
    %7 = arith.mulf %6, %5 : vector<64x128xf32>
    %cst_6 = arith.constant 0.707106769 : f32
    %8 = vector.broadcast %cst_6 : f32 to vector<64x128xf32>
    %9 = arith.mulf %5, %8 : vector<64x128xf32>
    %10 = math.absf %9 : vector<64x128xf32>
    %cst_7 = arith.constant 0.327591091 : f32
    %11 = vector.broadcast %cst_7 : f32 to vector<64x128xf32>
    %12 = arith.mulf %11, %10 : vector<64x128xf32>
    %cst_8 = arith.constant 1.000000e+00 : f32
    %13 = vector.broadcast %cst_8 : f32 to vector<64x128xf32>
    %14 = arith.addf %13, %12 : vector<64x128xf32>
    %15 = tpu.reciprocal %14 {approx = true} : vector<64x128xf32> -> vector<64x128xf32>
    %16 = arith.mulf %14, %15 : vector<64x128xf32>
    %cst_9 = arith.constant 2.000000e+00 : f32
    %17 = vector.broadcast %cst_9 : f32 to vector<64x128xf32>
    %18 = arith.subf %17, %16 : vector<64x128xf32>
    %19 = arith.mulf %15, %18 : vector<64x128xf32>
    %cst_10 = arith.constant 1.06140542 : f32
    %20 = vector.broadcast %cst_10 : f32 to vector<64x128xf32>
    %21 = arith.mulf %20, %19 : vector<64x128xf32>
    %cst_11 = arith.constant -1.45315206 : f32
    %22 = vector.broadcast %cst_11 : f32 to vector<64x128xf32>
    %23 = arith.addf %21, %22 : vector<64x128xf32>
    %24 = arith.mulf %23, %19 : vector<64x128xf32>
    %cst_12 = arith.constant 1.42141378 : f32
    %25 = vector.broadcast %cst_12 : f32 to vector<64x128xf32>
    %26 = arith.addf %24, %25 : vector<64x128xf32>
    %27 = arith.mulf %26, %19 : vector<64x128xf32>
    %cst_13 = arith.constant -0.284496725 : f32
    %28 = vector.broadcast %cst_13 : f32 to vector<64x128xf32>
    %29 = arith.addf %27, %28 : vector<64x128xf32>
    %30 = arith.mulf %29, %19 : vector<64x128xf32>
    %cst_14 = arith.constant 0.254829586 : f32
    %31 = vector.broadcast %cst_14 : f32 to vector<64x128xf32>
    %32 = arith.addf %30, %31 : vector<64x128xf32>
    %33 = arith.mulf %32, %19 : vector<64x128xf32>
    %cst_15 = arith.constant 0.000000e+00 : f32
    %34 = vector.broadcast %cst_15 : f32 to vector<64x128xf32>
    %35 = arith.subf %34, %10 : vector<64x128xf32>
    %36 = arith.mulf %35, %10 : vector<64x128xf32>
    %37 = math.exp %36 : vector<64x128xf32>
    %38 = arith.mulf %33, %37 : vector<64x128xf32>
    %cst_16 = arith.constant 1.000000e+00 : f32
    %39 = vector.broadcast %cst_16 : f32 to vector<64x128xf32>
    %40 = arith.subf %39, %38 : vector<64x128xf32>
    %cst_17 = arith.constant 0.000000e+00 : f32
    %41 = vector.broadcast %cst_17 : f32 to vector<64x128xf32>
    %42 = arith.cmpf oge, %9, %41 : vector<64x128xf32>
    %cst_18 = arith.constant 0.000000e+00 : f32
    %43 = vector.broadcast %cst_18 : f32 to vector<64x128xf32>
    %44 = arith.subf %43, %40 : vector<64x128xf32>
    %45 = arith.select %42, %40, %44 : vector<64x128xi1>, vector<64x128xf32>
    %cst_19 = arith.constant 1.000000e+00 : f32
    %46 = vector.broadcast %cst_19 : f32 to vector<64x128xf32>
    %47 = arith.addf %46, %45 : vector<64x128xf32>
    %48 = arith.mulf %7, %47 : vector<64x128xf32>
    %c0_20 = arith.constant 0 : index
    %c0_21 = arith.constant 0 : index
    %49 = vector.load %arg4[%c0_20, %c0_21] : memref<64x64xf32, #tpu.memory_space<vmem>>, vector<64x64xf32>
    %cst_22 = arith.constant dense<0.000000e+00> : vector<64x128xf32>
    %50 = tpu.matmul %49, %48, %cst_22 {dimension_numbers = #tpu.dot_dimension_numbers<[1], [0], [0], [1], [0, 0, 1, 1], [], []>} : vector<64x64xf32>, vector<64x128xf32>, vector<64x128xf32> -> vector<64x128xf32>
    %c0_23 = arith.constant 0 : index
    %c0_24 = arith.constant 0 : index
    %51 = vector.load %arg5[%c0_23, %c0_24] : memref<64x1xf32, #tpu.memory_space<vmem>>, vector<64x1xf32>
    %52 = vector.broadcast %51 : vector<64x1xf32> to vector<64x128xf32>
    %53 = arith.addf %50, %52 : vector<64x128xf32>
    %cst_25 = arith.constant 5.000000e-01 : f32
    %54 = vector.broadcast %cst_25 : f32 to vector<64x128xf32>
    %55 = arith.mulf %54, %53 : vector<64x128xf32>
    %cst_26 = arith.constant 0.707106769 : f32
    %56 = vector.broadcast %cst_26 : f32 to vector<64x128xf32>
    %57 = arith.mulf %53, %56 : vector<64x128xf32>
    %58 = math.absf %57 : vector<64x128xf32>
    %cst_27 = arith.constant 0.327591091 : f32
    %59 = vector.broadcast %cst_27 : f32 to vector<64x128xf32>
    %60 = arith.mulf %59, %58 : vector<64x128xf32>
    %cst_28 = arith.constant 1.000000e+00 : f32
    %61 = vector.broadcast %cst_28 : f32 to vector<64x128xf32>
    %62 = arith.addf %61, %60 : vector<64x128xf32>
    %63 = tpu.reciprocal %62 {approx = true} : vector<64x128xf32> -> vector<64x128xf32>
    %64 = arith.mulf %62, %63 : vector<64x128xf32>
    %cst_29 = arith.constant 2.000000e+00 : f32
    %65 = vector.broadcast %cst_29 : f32 to vector<64x128xf32>
    %66 = arith.subf %65, %64 : vector<64x128xf32>
    %67 = arith.mulf %63, %66 : vector<64x128xf32>
    %cst_30 = arith.constant 1.06140542 : f32
    %68 = vector.broadcast %cst_30 : f32 to vector<64x128xf32>
    %69 = arith.mulf %68, %67 : vector<64x128xf32>
    %cst_31 = arith.constant -1.45315206 : f32
    %70 = vector.broadcast %cst_31 : f32 to vector<64x128xf32>
    %71 = arith.addf %69, %70 : vector<64x128xf32>
    %72 = arith.mulf %71, %67 : vector<64x128xf32>
    %cst_32 = arith.constant 1.42141378 : f32
    %73 = vector.broadcast %cst_32 : f32 to vector<64x128xf32>
    %74 = arith.addf %72, %73 : vector<64x128xf32>
    %75 = arith.mulf %74, %67 : vector<64x128xf32>
    %cst_33 = arith.constant -0.284496725 : f32
    %76 = vector.broadcast %cst_33 : f32 to vector<64x128xf32>
    %77 = arith.addf %75, %76 : vector<64x128xf32>
    %78 = arith.mulf %77, %67 : vector<64x128xf32>
    %cst_34 = arith.constant 0.254829586 : f32
    %79 = vector.broadcast %cst_34 : f32 to vector<64x128xf32>
    %80 = arith.addf %78, %79 : vector<64x128xf32>
    %81 = arith.mulf %80, %67 : vector<64x128xf32>
    %cst_35 = arith.constant 0.000000e+00 : f32
    %82 = vector.broadcast %cst_35 : f32 to vector<64x128xf32>
    %83 = arith.subf %82, %58 : vector<64x128xf32>
    %84 = arith.mulf %83, %58 : vector<64x128xf32>
    %85 = math.exp %84 : vector<64x128xf32>
    %86 = arith.mulf %81, %85 : vector<64x128xf32>
    %cst_36 = arith.constant 1.000000e+00 : f32
    %87 = vector.broadcast %cst_36 : f32 to vector<64x128xf32>
    %88 = arith.subf %87, %86 : vector<64x128xf32>
    %cst_37 = arith.constant 0.000000e+00 : f32
    %89 = vector.broadcast %cst_37 : f32 to vector<64x128xf32>
    %90 = arith.cmpf oge, %57, %89 : vector<64x128xf32>
    %cst_38 = arith.constant 0.000000e+00 : f32
    %91 = vector.broadcast %cst_38 : f32 to vector<64x128xf32>
    %92 = arith.subf %91, %88 : vector<64x128xf32>
    %93 = arith.select %90, %88, %92 : vector<64x128xi1>, vector<64x128xf32>
    %cst_39 = arith.constant 1.000000e+00 : f32
    %94 = vector.broadcast %cst_39 : f32 to vector<64x128xf32>
    %95 = arith.addf %94, %93 : vector<64x128xf32>
    %96 = arith.mulf %55, %95 : vector<64x128xf32>
    %c0_40 = arith.constant 0 : index
    %c0_41 = arith.constant 0 : index
    %97 = vector.load %arg6[%c0_40, %c0_41] : memref<1x64xf32, #tpu.memory_space<vmem>>, vector<1x64xf32>
    %cst_42 = arith.constant dense<0.000000e+00> : vector<1x128xf32>
    %98 = tpu.matmul %97, %96, %cst_42 {dimension_numbers = #tpu.dot_dimension_numbers<[1], [0], [0], [1], [0, 0, 1, 1], [], []>} : vector<1x64xf32>, vector<64x128xf32>, vector<1x128xf32> -> vector<1x128xf32>
    %c0_43 = arith.constant 0 : index
    %c0_44 = arith.constant 0 : index
    %99 = vector.load %arg7[%c0_43, %c0_44] : memref<1x1xf32, #tpu.memory_space<vmem>>, vector<1x1xf32>
    %100 = vector.broadcast %99 : vector<1x1xf32> to vector<1x128xf32>
    %101 = arith.addf %98, %100 : vector<1x128xf32>
    %c0_45 = arith.constant 0 : index
    %c0_46 = arith.constant 0 : index
    %102 = vector.load %arg8[%c0_45, %c0_46] : memref<1x128xf32, #tpu.memory_space<vmem>>, vector<1x128xf32>
    tpu.vector_store %arg8[%c0_45, %c0_46], %101 {strides = array<i32>} : memref<1x128xf32, #tpu.memory_space<vmem>>, vector<1x128xf32>,
    return
  }
  func.func @transform_0(%arg0: i32) -> (i32, i32) {
    %c0_i32 = arith.constant 0 : i32
    %c0_i32_0 = arith.constant 0 : i32
    return %c0_i32, %arg0 : i32, i32
  }
  func.func @transform_1(%arg0: i32) -> (i32, i32) {
    %c0_i32 = arith.constant 0 : i32
    %c0_i32_0 = arith.constant 0 : i32
    %c0_i32_1 = arith.constant 0 : i32
    return %c0_i32, %c0_i32_0 : i32, i32
  }
  func.func @transform_2(%arg0: i32) -> (i32, i32) {
    %c0_i32 = arith.constant 0 : i32
    %c0_i32_0 = arith.constant 0 : i32
    %c0_i32_1 = arith.constant 0 : i32
    return %c0_i32, %c0_i32_0 : i32, i32
  }
  func.func @transform_3(%arg0: i32) -> (i32, i32) {
    %c0_i32 = arith.constant 0 : i32
    %c0_i32_0 = arith.constant 0 : i32
    %c0_i32_1 = arith.constant 0 : i32
    return %c0_i32, %c0_i32_0 : i32, i32
  }
  func.func @transform_4(%arg0: i32) -> (i32, i32) {
    %c0_i32 = arith.constant 0 : i32
    %c0_i32_0 = arith.constant 0 : i32
    %c0_i32_1 = arith.constant 0 : i32
    return %c0_i32, %c0_i32_0 : i32, i32
  }
  func.func @transform_5(%arg0: i32) -> (i32, i32) {
    %c0_i32 = arith.constant 0 : i32
    %c0_i32_0 = arith.constant 0 : i32
    %c0_i32_1 = arith.constant 0 : i32
    return %c0_i32, %c0_i32_0 : i32, i32
  }
  func.func @transform_6(%arg0: i32) -> (i32, i32) {
    %c0_i32 = arith.constant 0 : i32
    %c0_i32_0 = arith.constant 0 : i32
    %c0_i32_1 = arith.constant 0 : i32
    return %c0_i32, %c0_i32_0 : i32, i32
  }
  func.func @transform_7(%arg0: i32) -> (i32, i32) {
    %c0_i32 = arith.constant 0 : i32
    %c0_i32_0 = arith.constant 0 : i32
    return %c0_i32, %arg0 : i32, i32
  }
}

</mosaic_0001>

<bundles_post_ra>
// kernel: net_forward.1
= control target key start
LH: loop header
LB: loop body
LE: loop exit
PB: predicated region body
PF: predicated region fallthrough
CT: control target
= control target key end

     0   :  { %vm110_vm0 = vcmask 1041408   ;;  %vm85_vm1 = vcmask 15360   ;;  %v1169_v3 = vmov 0   ;;  %vm507_vm2 = vcmask 523264   ;;  %s1601_s0 = inlined_call_operand.vmem [shape: f32[2,128], index: 0, kind: input, shape index: {}]   ;;  %s1602_s1 = inlined_call_operand.vmem [shape: f32[64,2], index: 1, kind: input, shape index: {}]   ;;  %s1603_s6 = inlined_call_operand.<no memory space> [shape: f32[1,1], index: 6, kind: input, shape index: {}]   ;;  %s1604_s2 = inlined_call_operand.vmem [shape: f32[64,1], index: 2, kind: input, shape index: {}]   ;;  %s1605_s4 = inlined_call_operand.vmem [shape: f32[64,1], index: 4, kind: input, shape index: {}]   ;;  %s1606_s3 = inlined_call_operand.vmem [shape: f32[64,64], index: 3, kind: input, shape index: {}]   ;;  %s1607_s5 = inlined_call_operand.vmem [shape: f32[1,64], index: 5, kind: input, shape index: {}]   ;;  %s1608_s7 = inlined_call_operand.vmem [shape: f32[1,128], index: 7, kind: output, shape index: {}]  }
   0x1   :  { %v28_v0 = vld [vmem:[%s1601_s0] sm:$0x3]  ;;  %v30_v2 = vld [vmem:[%s1602_s1 + $0x8] sm:$0xff]  ;;  %1103 = vset.pattern.permute.xlu0 %v1169_v3  ;;  %1104 = vset.pattern.permute.xlu1 %v1169_v3  ;;  %v12_v4 = vstv %s1603_s6  ;;  %v31_v5 = vld [vmem:[%s1602_s1 + $0x10] sm:$0xff]  ;;  %vm1171_vm11 = vmmov 0  }
   0x2   :  { %v29_v1 = vld [vmem:[%s1602_s1] sm:$0xff]  ;;  %1010 = vmatprep.subr.msk.mxu0 %vm110_vm0, %v28_v0  ;;  %13 = vst [vmem:[#allocation2] sm:$0x1] %v12_v4  ;;  %v39_v7 = vld [vmem:[%s1604_s2 + $0x10] sm:$0xff]  ;;  %v32_v8 = vld [vmem:[%s1602_s1 + $0x18] sm:$0xff] }
   0x3   :  { %1012 = vmatprep.mubr.msk.f32.mxu0 %vm85_vm1, %v29_v1  ;;  %1011 = vmatpush3.msk.msra.mxu0 %vm110_vm0, %v28_v0  ;;  %v37_v6 = vld [vmem:[%s1604_s2] sm:$0xff]  ;;  %v38_v10 = vld [vmem:[%s1604_s2 + $0x8] sm:$0xff]  ;;  %v40_v11 = vld [vmem:[%s1604_s2 + $0x18] sm:$0xff] }
   0x4   :  { %1013 = vmatmul.mubr.msk.f32.vlgmr.msra.gmra.mrb[0].mxu0 %vm85_vm1, %v30_v2  ;;  %47 = vperm.xlu0 %1103, %v37_v6   ;;  %v33_v9 = vld [vmem:[%s1602_s1 + $0x20] sm:$0xff]  ;;  %v34_v12 = vld [vmem:[%s1602_s1 + $0x28] sm:$0xff]  ;;  %v35_v13 = vld [vmem:[%s1602_s1 + $0x30] sm:$0xff] }
   0x5   :  { %1015 = vmatprep.mubr.msk.f32.mxu0 %vm85_vm1, %v31_v5  ;;  %57 = vperm.xlu1 %1104, %v39_v7   ;;  %v41_v14 = vld [vmem:[%s1604_s2 + $0x20] sm:$0xff]  ;;  %v42_v15 = vld [vmem:[%s1604_s2 + $0x28] sm:$0xff]  ;;  %v36_v16 = vld [vmem:[%s1602_s1 + $0x38] sm:$0xff] }
   0x6   :  { %v43_v17 = vld [vmem:[%s1604_s2 + $0x30] sm:$0xff]  ;;  %v44_v18 = vld [vmem:[%s1604_s2 + $0x38] sm:$0xff]  ;;  %v459_v19 = vld [vmem:[%s1605_s4] sm:$0xff] }
   0x7   :  { %v460_v20 = vld [vmem:[%s1605_s4 + $0x8] sm:$0xff]  ;;  %v461_v21 = vld [vmem:[%s1605_s4 + $0x10] sm:$0xff]  ;;  %v462_v22 = vld [vmem:[%s1605_s4 + $0x18] sm:$0xff] }
   0x8   :  { %1016 = vmatmul.mubr.msk.f32.gmra.mrb[2].mxu0 %vm85_vm1, %v32_v8  ;;  %52 = vperm.xlu0 %1103, %v38_v10   ;;  %v463_v23 = vld [vmem:[%s1605_s4 + $0x20] sm:$0xff]  ;;  %v464_v24 = vld [vmem:[%s1605_s4 + $0x28] sm:$0xff]  ;;  %v465_v25 = vld [vmem:[%s1605_s4 + $0x30] sm:$0xff] }
   0x9   :  { %1018 = vmatprep.mubr.msk.f32.mxu0 %vm85_vm1, %v33_v9  ;;  %62 = vperm.xlu1 %1104, %v40_v11   ;;  %v466_v26 = vld [vmem:[%s1605_s4 + $0x38] sm:$0xff]  ;;  %v870_v27 = vld [vmem:[#allocation2] sm:$0x1] }
   0xa   :  { %v451_v28 = vld [vmem:[%s1606_s3] sm:$0xff] }
   0xb   :  { %1040 = vmatprep.mubr.msk.f32.mxu1 %vm507_vm2, %v451_v28 }
   0xc   :  { %1019 = vmatmul.mubr.msk.f32.gmra.mrb[4].mxu0 %vm85_vm1, %v34_v12  ;;  %67 = vperm.xlu0 %1103, %v41_v14  }
   0xd   :  { %1021 = vmatprep.mubr.msk.f32.mxu0 %vm85_vm1, %v35_v13  ;;  %72 = vperm.xlu1 %1104, %v42_v15  }
  0x10   :  { %1022 = vmatmul.mubr.msk.f32.gmra.mrb[6].mxu0 %vm85_vm1, %v36_v16  ;;  %77 = vperm.xlu0 %1103, %v43_v17  }
  0x11   :  { %82 = vperm.xlu1 %1104, %v44_v18  }
  0x14   :  { %469 = vperm.xlu0 %1103, %v459_v19  }
  0x15   :  { %474 = vperm.xlu1 %1104, %v460_v20  }
  0x18   :  { %479 = vperm.xlu0 %1103, %v461_v21  }
  0x19   :  { %484 = vperm.xlu1 %1104, %v462_v22  }
  0x1c   :  { %489 = vperm.xlu0 %1103, %v463_v23  }
  0x1d   :  { %494 = vperm.xlu1 %1104, %v464_v24  }
  0x20   :  { %499 = vperm.xlu0 %1103, %v465_v25  }
  0x21   :  { %504 = vperm.xlu1 %1104, %v466_v26  }
  0x24   :  { %873 = vperm.xlu0 %1103, %v870_v27  }
  0x83   :  { %v48_v29 = vpop.permute.xlu0 %47 }
  0x84   :  { %v58_v30 = vpop.permute.xlu1 %57 }
  0x87   :  { %v53_v31 = vpop.permute.xlu0 %52 }
  0x88   :  { %v63_v37 = vpop.permute.xlu1 %62 }
  0x8b   :  { %v68_v56 = vpop.permute.xlu0 %67 }
  0x8c   :  { %v73_v52 = vpop.permute.xlu1 %72 }
  0x8f   :  { %v78_v5 = vpop.permute.xlu0 %77 }
  0x90   :  { %v83_v3 = vpop.permute.xlu1 %82 }
  0xd7   :  { %v1014_v32 = vpop.f32.mrb[0].mxu0 }
  0xd8   :  { %v186_v33 = vadd.f32 %v1014_v32, %v53_v31  ;;  %v180_v34 = vpop.f32.mrb[1].mxu0 }
  0xd9   :  { %v181_v35 = vadd.f32 %v180_v34, %v48_v29 }
  0xda   :  { %v1305_v36 = vmul.f32 0.70710677, %v186_v33  ;;  %v1330_v10 = vmul.f32 0.5, %v186_v33 }
  0xdb   :  { %v1307_v38 = vmul.f32 0.70710677, %v181_v35  ;;  %v1017_v39 = vpop.f32.mrb[2].mxu0  ;;  %v1332_v11 = vmul.f32 0.5, %v181_v35 }
  0xdc   :  { %v236_v40 = vand.u32 2147483647, %v1305_v36  ;;  %v196_v41 = vadd.f32 %v1017_v39, %v63_v37  ;;  %v190_v42 = vpop.f32.mrb[3].mxu0  ;;  %vm412_vm4 = vcmp.ge.f32.partialorder %v1305_v36, 0.0 }
  0xdd   :  { %v235_v43 = vand.u32 2147483647, %v1307_v38  ;;  %v191_v44 = vadd.f32 %v190_v42, %v58_v30  ;;  %vm411_vm3 = vcmp.ge.f32.partialorder %v1307_v38, 0.0 }
  0xde   :  { %v244_v45 = vmul.f32 0.3275911, %v236_v40  ;;  %v1311_v46 = vmul.f32 0.70710677, %v196_v41  ;;  %v364_v1 = vsub.f32 0.0, %v236_v40  ;;  %v1337_v15 = vmul.f32 0.5, %v196_v41 }
  0xdf   :  { %v243_v47 = vmul.f32 0.3275911, %v235_v43  ;;  %v1313_v48 = vmul.f32 0.70710677, %v191_v44  ;;  %v1020_v51 = vpop.f32.mrb[4].mxu0  ;;  %v363_v6 = vsub.f32 0.0, %v235_v43 }
  0xe0   :  { %v252_v49 = vadd.f32 1.0, %v244_v45  ;;  %v238_v50 = vand.u32 2147483647, %v1311_v46  ;;  %v200_v55 = vpop.f32.mrb[5].mxu0  ;;  %v1317_v61 = vadd.f32 %v1020_v51, %v73_v52  ;;  %v372_v14 = vmul.f32 %v364_v1, %v236_v40 }
  0xe1   :  { %v251_v53 = vadd.f32 1.0, %v243_v47  ;;  %v237_v54 = vand.u32 2147483647, %v1313_v48  ;;  %v1319_v0 = vadd.f32 %v200_v55, %v68_v56  ;;  %v1342_v18 = vmul.f32 0.5, %v191_v44 }
  0xe2   :  { %1105 = vrcp.f32 %v252_v49  ;;  %v246_v57 = vmul.f32 0.3275911, %v238_v50  ;;  %v1322_v2 = vmul.f32 0.70710677, %v1317_v61  ;;  %v366_v7 = vsub.f32 0.0, %v238_v50 }
  0xe3   :  { %1107 = vrcp.f32 %v251_v53  ;;  %v245_v58 = vmul.f32 0.3275911, %v237_v54  ;;  %v1023_v59 = vpop.f32.mrb[6].mxu0  ;;  %v1325_v4 = vmul.f32 0.70710677, %v1319_v0  ;;  %v365_v19 = vsub.f32 0.0, %v237_v54 }
  0xe4   :  { %v254_v60 = vadd.f32 1.0, %v246_v57  ;;  %v210_v62 = vpop.f32.mrb[7].mxu0  ;;  %v240_v8 = vand.u32 2147483647, %v1322_v2  ;;  %v1328_v9 = vadd.f32 %v1023_v59, %v83_v3  ;;  %v371_v23 = vmul.f32 %v363_v6, %v235_v43 }
  0xe5   :  { %v253_v63 = vadd.f32 1.0, %v245_v58  ;;  %v239_v12 = vand.u32 2147483647, %v1325_v4  ;;  %v1335_v13 = vadd.f32 %v210_v62, %v78_v5  ;;  %v374_v24 = vmul.f32 %v366_v7, %v238_v50 }
  0xe6   :  { %1109 = vrcp.f32 %v254_v60  ;;  %v248_v16 = vmul.f32 0.3275911, %v240_v8  ;;  %v1340_v17 = vmul.f32 0.70710677, %v1328_v9  ;;  %v368_v29 = vsub.f32 0.0, %v240_v8 }
  0xe7   :  { %1111 = vrcp.f32 %v253_v63  ;;  %v247_v20 = vmul.f32 0.3275911, %v239_v12  ;;  %v1345_v21 = vmul.f32 0.70710677, %v1335_v13  ;;  %v381_v32 = vmul.f32 1.442695, %v372_v14 }
  0xe8   :  { %v256_v25 = vadd.f32 1.0, %v248_v16  ;;  %v242_v26 = vand.u32 2147483647, %v1340_v17  ;;  %v373_v37 = vmul.f32 %v365_v19, %v237_v54  ;;  %v367_v39 = vsub.f32 0.0, %v239_v12 }
  0xe9   :  { %v255_v30 = vadd.f32 1.0, %v247_v20  ;;  %v241_v31 = vand.u32 2147483647, %v1345_v21  ;;  %v379_v42 = vmul.f32 1.442695, %v371_v23  ;;  %v376_v51 = vmul.f32 %v368_v29, %v240_v8 }
  0xea   :  { %1113 = vrcp.f32 %v256_v25  ;;  %v250_v34 = vmul.f32 0.3275911, %v242_v26  ;;  %v385_v50 = vmul.f32 1.442695, %v374_v24  ;;  %v383_v54 = vmul.f32 1.442695, %v373_v37 }
  0xeb   :  { %1115 = vrcp.f32 %v255_v30  ;;  %v249_v44 = vmul.f32 0.3275911, %v241_v31  ;;  %v375_v57 = vmul.f32 %v367_v39, %v239_v12  ;;  %v370_v58 = vsub.f32 0.0, %v242_v26 }
  0xec   :  { %v1106_v22 = vpop.eup %1105  ;;  %v258_v43 = vadd.f32 1.0, %v250_v34  ;;  %v369_v5 = vsub.f32 0.0, %v241_v31  ;;  %vm414_vm5 = vcmp.ge.f32.partialorder %v1311_v46, 0.0  ;;  %vm413_vm6 = vcmp.ge.f32.partialorder %v1313_v48, 0.0 }
  0xed   :  { %v1108_v27 = vpop.eup %1107  ;;  %v268_v28 = vmul.f32 %v1106_v22, %v252_v49  ;;  %v257_v55 = vadd.f32 1.0, %v249_v44  ;;  %v387_v12 = vmul.f32 1.442695, %v375_v57  ;;  %v378_v14 = vmul.f32 %v370_v58, %v242_v26 }
  0xee   :  { %v267_v33 = vmul.f32 %v1108_v27, %v251_v53  ;;  %1117 = vrcp.f32 %v258_v43  ;;  %vm416_vm7 = vcmp.ge.f32.partialorder %v1322_v2, 0.0  ;;  %vm415_vm8 = vcmp.ge.f32.partialorder %v1325_v4, 0.0 }
  0xef   :  { %v276_v35 = vsub.f32 2.0, %v268_v28  ;;  %1119 = vrcp.f32 %v257_v55  ;;  %v377_v28 = vmul.f32 %v369_v5, %v241_v31  ;;  %v393_v37 = vmul.f32 1.442695, %v378_v14 }
  0xf0   :  { %v1110_v40 = vpop.eup %1109  ;;  %v275_v41 = vsub.f32 2.0, %v267_v33  ;;  %1121 = vpow2.f32 %v381_v32  ;;  %vm418_vm9 = vcmp.ge.f32.partialorder %v1340_v17, 0.0  ;;  %vm417_vm10 = vcmp.ge.f32.partialorder %v1345_v21, 0.0  ;;  %v455_v21 = vld [vmem:[%s1606_s3 + $0x20] sm:$0xff] }
  0xf1   :  { %v1112_v45 = vpop.eup %1111  ;;  %v1349_v47 = vmul.f32 %v1106_v22, %v276_v35  ;;  %v270_v49 = vmul.f32 %v1110_v40, %v254_v60  ;;  %v389_v60 = vmul.f32 1.442695, %v376_v51  ;;  %1123 = vpow2.f32 %v379_v42 }
  0xf2   :  { %v1351_v52 = vmul.f32 %v1108_v27, %v275_v41  ;;  %v269_v53 = vmul.f32 %v1112_v45, %v253_v63  ;;  %1125 = vpow2.f32 %v385_v50 }
  0xf3   :  { %v278_v56 = vsub.f32 2.0, %v270_v49  ;;  %v292_v1 = vmul.f32 1.0614054, %v1349_v47  ;;  %1127 = vpow2.f32 %v383_v54 }
  0xf4   :  { %v277_v59 = vsub.f32 2.0, %v269_v53  ;;  %v291_v62 = vmul.f32 1.0614054, %v1351_v52  ;;  %v1114_v16 = vpop.eup %1113  ;;  %1129 = vpow2.f32 %v389_v60 }
  0xf5   :  { %v1355_v3 = vmul.f32 %v1110_v40, %v278_v56  ;;  %v300_v7 = vadd.f32 -1.4531521, %v292_v1  ;;  %v1116_v23 = vpop.eup %1115  ;;  %v272_v27 = vmul.f32 %v1114_v16, %v256_v25  ;;  %1131 = vpow2.f32 %v387_v12 }
  0xf6   :  { %v1357_v6 = vmul.f32 %v1112_v45, %v277_v59  ;;  %v299_v63 = vadd.f32 -1.4531521, %v291_v62  ;;  %v271_v32 = vmul.f32 %v1116_v23, %v255_v30  ;;  %v391_v30 = vmul.f32 1.442695, %v377_v28 }
  0xf7   :  { %v294_v8 = vmul.f32 1.0614054, %v1355_v3  ;;  %v308_v22 = vmul.f32 %v300_v7, %v1349_v47  ;;  %v280_v26 = vsub.f32 2.0, %v272_v27  ;;  %1133 = vpow2.f32 %v393_v37 }
  0xf8   :  { %v293_v19 = vmul.f32 1.0614054, %v1357_v6  ;;  %v307_v20 = vmul.f32 %v299_v63, %v1351_v52  ;;  %v1118_v39 = vpop.eup %1117  ;;  %v279_v41 = vsub.f32 2.0, %v271_v32  ;;  %1135 = vpow2.f32 %v391_v30 }
  0xf9   :  { %v302_v24 = vadd.f32 -1.4531521, %v294_v8  ;;  %v316_v34 = vadd.f32 1.4214138, %v308_v22  ;;  %v1367_v45 = vmul.f32 %v1114_v16, %v280_v26  ;;  %v274_v31 = vmul.f32 %v1118_v39, %v258_v43  ;;  %v1120_v49 = vpop.eup %1119 }
  0xfa   :  { %v301_v29 = vadd.f32 -1.4531521, %v293_v19  ;;  %v315_v33 = vadd.f32 1.4214138, %v307_v20  ;;  %v1369_v51 = vmul.f32 %v1116_v23, %v279_v41  ;;  %v1122_v54 = vpop.eup %1121  ;;  %v273_v62 = vmul.f32 %v1120_v49, %v257_v55 }
  0xfb   :  { %v310_v35 = vmul.f32 %v302_v24, %v1355_v3  ;;  %v324_v44 = vmul.f32 %v316_v34, %v1349_v47  ;;  %v296_v58 = vmul.f32 1.0614054, %v1367_v45  ;;  %v282_v59 = vsub.f32 2.0, %v274_v31  ;;  %v1124_v1 = vpop.eup %1123 }
  0xfc   :  { %v309_v40 = vmul.f32 %v301_v29, %v1357_v6  ;;  %v323_v42 = vmul.f32 %v315_v33, %v1351_v52  ;;  %v295_v5 = vmul.f32 1.0614054, %v1369_v51  ;;  %v1126_v7 = vpop.eup %1125  ;;  %v281_v16 = vsub.f32 2.0, %v273_v62 }
  0xfd   :  { %v318_v25 = vadd.f32 1.4214138, %v310_v35  ;;  %v332_v56 = vadd.f32 -0.28449672, %v324_v44  ;;  %v304_v12 = vadd.f32 -1.4531521, %v296_v58  ;;  %v1377_v14 = vmul.f32 %v1118_v39, %v282_v59  ;;  %v1128_v19 = vpop.eup %1127 }
  0xfe   :  { %v317_v50 = vadd.f32 1.4214138, %v309_v40  ;;  %v331_v53 = vadd.f32 -0.28449672, %v323_v42  ;;  %v303_v22 = vadd.f32 -1.4531521, %v295_v5  ;;  %v1379_v23 = vpop.eup %1129  ;;  %v1384_v29 = vmul.f32 %v1120_v49, %v281_v16 }
  0xff   :  { %v326_v57 = vmul.f32 %v318_v25, %v1355_v3  ;;  %v340_v63 = vmul.f32 %v332_v56, %v1349_v47  ;;  %v312_v27 = vmul.f32 %v304_v12, %v1367_v45  ;;  %v298_v28 = vmul.f32 1.0614054, %v1377_v14  ;;  %v1132_v26 = vpop.eup %1131 }
 0x100   :  { %v325_v60 = vmul.f32 %v317_v50, %v1357_v6  ;;  %v339_v43 = vmul.f32 %v331_v53, %v1351_v52  ;;  %v311_v33 = vmul.f32 %v303_v22, %v1369_v51  ;;  %v297_v44 = vmul.f32 1.0614054, %v1384_v29 }
 0x101   :  { %v334_v8 = vadd.f32 -0.28449672, %v326_v57  ;;  %v348_v34 = vadd.f32 0.2548296, %v340_v63  ;;  %v320_v39 = vadd.f32 1.4214138, %v312_v27 }
 0x102   :  { %v333_v20 = vadd.f32 -0.28449672, %v325_v60  ;;  %v347_v55 = vadd.f32 0.2548296, %v339_v43  ;;  %v306_v40 = vadd.f32 -1.4531521, %v298_v28 }
 0x103   :  { %v342_v24 = vmul.f32 %v334_v8, %v1355_v3  ;;  %v319_v42 = vadd.f32 1.4214138, %v311_v33  ;;  %v356_v25 = vmul.f32 %v348_v34, %v1349_v47  ;;  %v305_v56 = vadd.f32 -1.4531521, %v297_v44 }
 0x104   :  { %v341_v32 = vmul.f32 %v333_v20, %v1357_v6  ;;  %v355_v35 = vmul.f32 %v347_v55, %v1351_v52  ;;  %v328_v52 = vmul.f32 %v320_v39, %v1367_v45  ;;  %v314_v49 = vmul.f32 %v306_v40, %v1377_v14 }
 0x105   :  { %v350_v37 = vadd.f32 0.2548296, %v342_v24  ;;  %v327_v30 = vmul.f32 %v319_v42, %v1369_v51  ;;  %v396_v57 = vmul.f32 %v1122_v54, %v356_v25 }
 0x106   :  { %v349_v41 = vadd.f32 0.2548296, %v341_v32  ;;  %v395_v50 = vmul.f32 %v1124_v1, %v355_v35  ;;  %v336_v59 = vadd.f32 -0.28449672, %v328_v52  ;;  %v322_v62 = vadd.f32 1.4214138, %v314_v49 }
 0x107   :  { %v358_v31 = vmul.f32 %v350_v37, %v1355_v3  ;;  %v335_v5 = vadd.f32 -0.28449672, %v327_v30  ;;  %v313_v3 = vmul.f32 %v305_v56, %v1384_v29  ;;  %v404_v43 = vsub.f32 1.0, %v396_v57 }
 0x108   :  { %v357_v53 = vmul.f32 %v349_v41, %v1357_v6  ;;  %v403_v60 = vsub.f32 1.0, %v395_v50  ;;  %v344_v8 = vmul.f32 %v336_v59, %v1367_v45  ;;  %v330_v1 = vmul.f32 %v322_v62, %v1377_v14  ;;  %v1134_v6 = vpop.eup %1133 }
 0x109   :  { %v398_v58 = vmul.f32 %v1126_v7, %v358_v31  ;;  %v343_v20 = vmul.f32 %v335_v5, %v1369_v51  ;;  %v321_v54 = vadd.f32 1.4214138, %v313_v3  ;;  %v420_v7 = vsub.f32 0.0, %v404_v43  ;;  %v1136_v34 = vpop.eup %1135 }
 0x10a   :  { %v397_v47 = vmul.f32 %v1128_v19, %v357_v53  ;;  %v419_v12 = vsub.f32 0.0, %v403_v60  ;;  %v352_v55 = vadd.f32 0.2548296, %v344_v8  ;;  %v338_v24 = vadd.f32 -0.28449672, %v330_v1 }
 0x10b   :  { %v406_v63 = vsub.f32 1.0, %v398_v58  ;;  %v351_v28 = vadd.f32 0.2548296, %v343_v20  ;;  %v329_v32 = vmul.f32 %v321_v54, %v1384_v29  ;;  %v428_v33 = vsel %vm412_vm4, %v404_v43, %v420_v7  ;;  %v452_v7 = vld [vmem:[%s1606_s3 + $0x8] sm:$0xff] }
 0x10c   :  { %v405_v16 = vsub.f32 1.0, %v397_v47  ;;  %v427_v19 = vsel %vm411_vm3, %v403_v60, %v419_v12  ;;  %v360_v37 = vmul.f32 %v352_v55, %v1367_v45  ;;  %v346_v39 = vmul.f32 %v338_v24, %v1377_v14  ;;  %v457_v55 = vld [vmem:[%s1606_s3 + $0x30] sm:$0xff]  ;;  %v458_v24 = vld [vmem:[%s1606_s3 + $0x38] sm:$0xff] }
 0x10d   :  { %v422_v22 = vsub.f32 0.0, %v406_v63  ;;  %v435_v40 = vadd.f32 1.0, %v427_v19  ;;  %v359_v42 = vmul.f32 %v351_v28, %v1369_v51  ;;  %v337_v44 = vadd.f32 -0.28449672, %v329_v32  ;;  %v475_v28 = vpop.permute.xlu1 %474  ;;  %v470_v32 = vpop.permute.xlu0 %469 }
 0x10e   :  { %v421_v27 = vsub.f32 0.0, %v405_v16  ;;  %v400_v36 = vmul.f32 %v1379_v23, %v360_v37  ;;  %v354_v31 = vadd.f32 0.2548296, %v346_v39  ;;  %v436_v52 = vadd.f32 1.0, %v428_v33 }
 0x10f   :  { %v430_v35 = vsel %vm414_vm5, %v406_v63, %v422_v22  ;;  %v399_v49 = vmul.f32 %v1132_v26, %v359_v42  ;;  %v345_v45 = vmul.f32 %v337_v44, %v1384_v29  ;;  %v443_v50 = vmul.f32 %v435_v40, %v1332_v11  ;;  %v456_v22 = vld [vmem:[%s1606_s3 + $0x28] sm:$0xff] }
 0x110   :  { %v438_v41 = vadd.f32 1.0, %v430_v35  ;;  %v429_v38 = vsel %vm413_vm6, %v405_v16, %v421_v27  ;;  %v408_v30 = vsub.f32 1.0, %v400_v36  ;;  %v362_v48 = vmul.f32 %v354_v31, %v1377_v14 }
 0x111   :  { %v437_v25 = vadd.f32 1.0, %v429_v38  ;;  %v444_v51 = vmul.f32 %v436_v52, %v1330_v10  ;;  %v407_v56 = vsub.f32 1.0, %v399_v49  ;;  %v353_v57 = vadd.f32 0.2548296, %v345_v45  ;;  %v485_v40 = vpop.permute.xlu1 %484  ;;  %v480_v42 = vpop.permute.xlu0 %479 }
 0x112   :  { %v446_v46 = vmul.f32 %v438_v41, %v1337_v15  ;;  %v424_v58 = vsub.f32 0.0, %v408_v30  ;;  %v402_v23 = vmul.f32 %v1134_v6, %v362_v48  ;;  %v223_v5 = vmul.f32 0.5, %v1319_v0 }
 0x113   :  { %v445_v53 = vmul.f32 %v437_v25, %v1342_v18  ;;  %v1071_v59 = vpack.c.bf16 %v444_v51, %v443_v50  ;;  %v423_v15 = vsub.f32 0.0, %v407_v56  ;;  %v361_v26 = vmul.f32 %v353_v57, %v1384_v29 }
 0x114   :  { %v432_v60 = vsel %vm416_vm7, %v408_v30, %v424_v58  ;;  %v410_v11 = vsub.f32 1.0, %v402_v23  ;;  %v224_v18 = vmul.f32 0.5, %v1317_v61  ;;  %v226_v61 = vmul.f32 0.5, %v1328_v9  ;;  %v453_v9 = vld [vmem:[%s1606_s3 + $0x10] sm:$0xff] }
 0x115   :  { %v1075_v62 = vpack.c.bf16 %v446_v46, %v445_v53  ;;  %1072 = vmatprep.subr.bf16.mxu1 %v1071_v59  ;;  %v440_v14 = vadd.f32 1.0, %v432_v60  ;;  %v431_v10 = vsel %vm415_vm8, %v407_v56, %v423_v15  ;;  %v401_v47 = vmul.f32 %v1136_v34, %v361_v26  ;;  %v495_v51 = vpop.permute.xlu1 %494  ;;  %v490_v23 = vpop.permute.xlu0 %489 }
 0x116   :  { %1074 = vmatpush3.bf16.msra.mxu1 %v1071_v59  ;;  %v439_v3 = vadd.f32 1.0, %v431_v10  ;;  %v426_v43 = vsub.f32 0.0, %v410_v11  ;;  %v225_v0 = vmul.f32 0.5, %v1335_v13  ;;  %v454_v13 = vld [vmem:[%s1606_s3 + $0x18] sm:$0xff]  ;;  %v1170_v19 = vmov 0.0|0.0  }
 0x117   :  { %1076 = vmatprep.subr.bf16.mxu1 %v1075_v62  ;;  %v448_v2 = vmul.f32 %v440_v14, %v224_v18  ;;  %v409_v29 = vsub.f32 1.0, %v401_v47  ;;  %1087 = vmatprep.subr.bf16.mxu0 %v1170_v19  ;;  %v1172_v27 = vmov 0.0  }
 0x118   :  { %v447_v63 = vmul.f32 %v439_v3, %v223_v5  ;;  %v434_v8 = vsel %vm418_vm9, %v410_v11, %v426_v43  ;;  %1068 = vmatprep.mubr.msk.f32.mxu0 %vm1171_vm11, %v1172_v27 }
 0x119   :  { %v442_v4 = vadd.f32 1.0, %v434_v8  ;;  %v425_v1 = vsub.f32 0.0, %v409_v29  ;;  %v505_v3 = vpop.permute.xlu1 %504 }
 0x11a   :  { %1078 = vmatpush3.bf16.msra.mxu1 %v1075_v62  ;;  %v1079_v12 = vpack.c.bf16 %v448_v2, %v447_v63  ;;  %v500_v2 = vpop.permute.xlu0 %499 }
 0x11b   :  { %v433_v6 = vsel %vm417_vm10, %v409_v29, %v425_v1  ;;  %v450_v16 = vmul.f32 %v442_v4, %v226_v61 }
 0x11c   :  { %v441_v20 = vadd.f32 1.0, %v433_v6  ;;  %1080 = vmatprep.subr.bf16.mxu1 %v1079_v12 }
 0x11e   :  { %1082 = vmatpush3.bf16.msra.mxu1 %v1079_v12  ;;  %v449_v54 = vmul.f32 %v441_v20, %v225_v0 }
 0x120   :  { %v1083_v17 = vpack.c.bf16 %v450_v16, %v449_v54 }
 0x122   :  { %1084 = vmatprep.subr.bf16.mxu1 %v1083_v17 }
 0x123   :  { %1086 = vmatpush3.bf16.msra.mxu1 %v1083_v17 }
 0x126   :  { %1041 = vmatmul.mubr.msk.f32.vlgmr.msra.gmra.mrb[0].mxu1 %vm507_vm2, %v452_v7 }
 0x127   :  { %1043 = vmatprep.mubr.msk.f32.mxu1 %vm507_vm2, %v453_v9 }
 0x12a   :  { %1044 = vmatmul.mubr.msk.f32.gmra.mrb[2].mxu1 %vm507_vm2, %v454_v13 }
 0x12b   :  { %1046 = vmatprep.mubr.msk.f32.mxu1 %vm507_vm2, %v455_v21 }
 0x12e   :  { %1047 = vmatmul.mubr.msk.f32.gmra.mrb[4].mxu1 %vm507_vm2, %v456_v22 }
 0x12f   :  { %1049 = vmatprep.mubr.msk.f32.mxu1 %vm507_vm2, %v457_v55 }
 0x132   :  { %1050 = vmatmul.mubr.msk.f32.gmra.mrb[6].mxu1 %vm507_vm2, %v458_v24 }
 0x1f9   :  { %v1042_v33 = vpop.f32.mrb[0].mxu1 }
 0x1fa   :  { %v604_v34 = vadd.f32 %v1042_v33, %v475_v28  ;;  %v598_v35 = vpop.f32.mrb[1].mxu1 }
 0x1fb   :  { %v599_v37 = vadd.f32 %v598_v35, %v470_v32 }
 0x1fc   :  { %v1461_v39 = vmul.f32 0.70710677, %v604_v34  ;;  %v1486_v1 = vmul.f32 0.5, %v604_v34 }
 0x1fd   :  { %v1463_v41 = vmul.f32 0.70710677, %v599_v37  ;;  %v1045_v38 = vpop.f32.mrb[2].mxu1  ;;  %v1488_v61 = vmul.f32 0.5, %v599_v37 }
 0x1fe   :  { %v654_v44 = vand.u32 2147483647, %v1461_v39  ;;  %v614_v25 = vadd.f32 %v1045_v38, %v485_v40  ;;  %v608_v36 = vpop.f32.mrb[3].mxu1  ;;  %vm830_vm12 = vcmp.ge.f32.partialorder %v1461_v39, 0.0 }
 0x1ff   :  { %v653_v31 = vand.u32 2147483647, %v1463_v41  ;;  %v609_v52 = vadd.f32 %v608_v36, %v480_v42  ;;  %vm829_vm13 = vcmp.ge.f32.partialorder %v1463_v41, 0.0 }
 0x200   :  { %v662_v46 = vmul.f32 0.3275911, %v654_v44  ;;  %v1467_v49 = vmul.f32 0.70710677, %v614_v25  ;;  %v782_v26 = vsub.f32 0.0, %v654_v44  ;;  %v1493_v0 = vmul.f32 0.5, %v614_v25 }
 0x201   :  { %v661_v45 = vmul.f32 0.3275911, %v653_v31  ;;  %v1469_v50 = vmul.f32 0.70710677, %v609_v52  ;;  %v1048_v48 = vpop.f32.mrb[4].mxu1  ;;  %v781_v47 = vsub.f32 0.0, %v653_v31 }
 0x202   :  { %v670_v53 = vadd.f32 1.0, %v662_v46  ;;  %v656_v30 = vand.u32 2147483647, %v1467_v49  ;;  %v618_v58 = vpop.f32.mrb[5].mxu1  ;;  %v1473_v11 = vadd.f32 %v1048_v48, %v495_v51  ;;  %v790_v29 = vmul.f32 %v782_v26, %v654_v44 }
 0x203   :  { %v669_v56 = vadd.f32 1.0, %v661_v45  ;;  %v655_v57 = vand.u32 2147483647, %v1469_v50  ;;  %v1475_v10 = vadd.f32 %v618_v58, %v490_v23  ;;  %v789_v16 = vmul.f32 %v781_v47, %v653_v31 }
 0x204   :  { %1137 = vrcp.f32 %v670_v53  ;;  %v664_v59 = vmul.f32 0.3275911, %v656_v30  ;;  %v1478_v5 = vmul.f32 0.70710677, %v1473_v11  ;;  %v784_v63 = vsub.f32 0.0, %v656_v30 }
 0x205   :  { %1139 = vrcp.f32 %v669_v56  ;;  %v663_v62 = vmul.f32 0.3275911, %v655_v57  ;;  %v1051_v15 = vpop.f32.mrb[6].mxu1  ;;  %v1481_v43 = vmul.f32 0.70710677, %v1475_v10  ;;  %v1498_v17 = vmul.f32 0.5, %v609_v52 }
 0x206   :  { %v672_v60 = vadd.f32 1.0, %v664_v59  ;;  %v628_v18 = vpop.f32.mrb[7].mxu1  ;;  %v658_v8 = vand.u32 2147483647, %v1478_v5  ;;  %v1484_v4 = vadd.f32 %v1051_v15, %v505_v3  ;;  %v783_v7 = vsub.f32 0.0, %v655_v57 }
 0x207   :  { %v671_v14 = vadd.f32 1.0, %v663_v62  ;;  %v657_v12 = vand.u32 2147483647, %v1481_v43  ;;  %v1491_v6 = vadd.f32 %v628_v18, %v500_v2  ;;  %v799_v22 = vmul.f32 1.442695, %v790_v29 }
 0x208   :  { %1141 = vrcp.f32 %v672_v60  ;;  %v666_v20 = vmul.f32 0.3275911, %v658_v8  ;;  %v1496_v54 = vmul.f32 0.70710677, %v1484_v4  ;;  %v792_v55 = vmul.f32 %v784_v63, %v656_v30 }
 0x209   :  { %1143 = vrcp.f32 %v671_v14  ;;  %v665_v9 = vmul.f32 0.3275911, %v657_v12  ;;  %v1501_v13 = vmul.f32 0.70710677, %v1491_v6  ;;  %v786_v33 = vsub.f32 0.0, %v658_v8 }
 0x20a   :  { %v674_v24 = vadd.f32 1.0, %v666_v20  ;;  %v660_v27 = vand.u32 2147483647, %v1496_v54  ;;  %v797_v40 = vmul.f32 1.442695, %v789_v16  ;;  %v791_v44 = vmul.f32 %v783_v7, %v655_v57 }
 0x20b   :  { %v673_v34 = vadd.f32 1.0, %v665_v9  ;;  %v659_v35 = vand.u32 2147483647, %v1501_v13  ;;  %v785_v25 = vsub.f32 0.0, %v657_v12  ;;  %v803_v51 = vmul.f32 1.442695, %v792_v55 }
 0x20c   :  { %1145 = vrcp.f32 %v674_v24  ;;  %v668_v38 = vmul.f32 0.3275911, %v660_v27  ;;  %v788_v46 = vsub.f32 0.0, %v660_v27  ;;  %v794_v58 = vmul.f32 %v786_v33, %v658_v8 }
 0x20d   :  { %1147 = vrcp.f32 %v673_v34  ;;  %v667_v45 = vmul.f32 0.3275911, %v659_v35  ;;  %v801_v15 = vmul.f32 1.442695, %v791_v44  ;;  %v793_v26 = vmul.f32 %v785_v25, %v657_v12 }
 0x20e   :  { %v1138_v21 = vpop.eup %1137  ;;  %v676_v52 = vadd.f32 1.0, %v668_v38  ;;  %v796_v3 = vmul.f32 %v788_v46, %v660_v27  ;;  %v807_v29 = vmul.f32 1.442695, %v794_v58  ;;  %v787_v8 = vsub.f32 0.0, %v659_v35 }
 0x20f   :  { %v1140_v28 = vpop.eup %1139  ;;  %v686_v32 = vmul.f32 %v1138_v21, %v670_v53  ;;  %v675_v59 = vadd.f32 1.0, %v667_v45  ;;  %v805_v12 = vmul.f32 1.442695, %v793_v26  ;;  %vm832_vm14 = vcmp.ge.f32.partialorder %v1467_v49, 0.0 }
 0x210   :  { %v685_v37 = vmul.f32 %v1140_v28, %v669_v56  ;;  %1149 = vrcp.f32 %v676_v52  ;;  %v795_v38 = vmul.f32 %v787_v8, %v659_v35  ;;  %vm831_vm15 = vcmp.ge.f32.partialorder %v1469_v50, 0.0 }
 0x211   :  { %v694_v42 = vsub.f32 2.0, %v686_v32  ;;  %1151 = vrcp.f32 %v675_v59  ;;  %vm834_vm0 = vcmp.ge.f32.partialorder %v1478_v5, 0.0  ;;  %vm833_vm1 = vcmp.ge.f32.partialorder %v1481_v43, 0.0 }
 0x212   :  { %v1142_v36 = vpop.eup %1141  ;;  %v693_v31 = vsub.f32 2.0, %v685_v37  ;;  %1153 = vpow2.f32 %v799_v22  ;;  %v811_v22 = vmul.f32 1.442695, %v796_v3  ;;  %vm836_vm3 = vcmp.ge.f32.partialorder %v1496_v54, 0.0 }
 0x213   :  { %v1144_v30 = vpop.eup %1143  ;;  %v1505_v48 = vmul.f32 %v1138_v21, %v694_v42  ;;  %v688_v53 = vmul.f32 %v1142_v36, %v672_v60  ;;  %1155 = vpow2.f32 %v797_v40  ;;  %vm835_vm4 = vcmp.ge.f32.partialorder %v1501_v13, 0.0 }
 0x214   :  { %v1507_v23 = vmul.f32 %v1140_v28, %v693_v31  ;;  %v687_v56 = vmul.f32 %v1144_v30, %v671_v14  ;;  %1157 = vpow2.f32 %v803_v51 }
 0x215   :  { %v710_v57 = vmul.f32 1.0614054, %v1505_v48  ;;  %v696_v62 = vsub.f32 2.0, %v688_v53  ;;  %1159 = vpow2.f32 %v801_v15 }
 0x216   :  { %v709_v18 = vmul.f32 1.0614054, %v1507_v23  ;;  %v695_v47 = vsub.f32 2.0, %v687_v56  ;;  %v1146_v7 = vpop.eup %1145  ;;  %1161 = vpow2.f32 %v807_v29 }
 0x217   :  { %v718_v2 = vadd.f32 -1.4531521, %v710_v57  ;;  %v1511_v60 = vmul.f32 %v1142_v36, %v696_v62  ;;  %v1148_v55 = vpop.eup %1147  ;;  %v690_v32 = vmul.f32 %v1146_v7, %v674_v24  ;;  %1163 = vpow2.f32 %v805_v12 }
 0x218   :  { %v717_v63 = vadd.f32 -1.4531521, %v709_v18  ;;  %v1513_v14 = vmul.f32 %v1144_v30, %v695_v47  ;;  %v689_v40 = vmul.f32 %v1148_v55, %v673_v34  ;;  %1165 = vpow2.f32 %v811_v22 }
 0x219   :  { %v726_v16 = vmul.f32 %v718_v2, %v1505_v48  ;;  %v712_v20 = vmul.f32 1.0614054, %v1511_v60  ;;  %v698_v25 = vsub.f32 2.0, %v690_v32  ;;  %v809_v57 = vmul.f32 1.442695, %v795_v38 }
 0x21a   :  { %v725_v9 = vmul.f32 %v717_v63, %v1507_v23  ;;  %v711_v21 = vmul.f32 1.0614054, %v1513_v14  ;;  %v1150_v36 = vpop.eup %1149  ;;  %v697_v45 = vsub.f32 2.0, %v689_v40 }
 0x21b   :  { %v734_v27 = vadd.f32 1.4214138, %v726_v16  ;;  %v720_v28 = vadd.f32 -1.4531521, %v712_v20  ;;  %v1523_v53 = vmul.f32 %v1146_v7, %v698_v25  ;;  %v692_v51 = vmul.f32 %v1150_v36, %v676_v52  ;;  %v1152_v34 = vpop.eup %1151 }
 0x21c   :  { %v733_v33 = vadd.f32 1.4214138, %v725_v9  ;;  %v719_v37 = vadd.f32 -1.4531521, %v711_v21  ;;  %v1525_v56 = vmul.f32 %v1148_v55, %v697_v45  ;;  %v1154_v62 = vpop.eup %1153  ;;  %v691_v63 = vmul.f32 %v1152_v34, %v675_v59 }
 0x21d   :  { %v742_v42 = vmul.f32 %v734_v27, %v1505_v48  ;;  %v728_v44 = vmul.f32 %v720_v28, %v1511_v60  ;;  %v714_v18 = vmul.f32 1.0614054, %v1523_v53  ;;  %v700_v47 = vsub.f32 2.0, %v692_v51  ;;  %v1156_v3 = vpop.eup %1155 }
 0x21e   :  { %v741_v31 = vmul.f32 %v733_v33, %v1507_v23  ;;  %v727_v46 = vmul.f32 %v719_v37, %v1513_v14  ;;  %v713_v52 = vmul.f32 1.0614054, %v1525_v56  ;;  %v1158_v8 = vpop.eup %1157  ;;  %1167 = vpow2.f32 %v809_v57 }
 0x21f   :  { %v750_v30 = vadd.f32 -0.28449672, %v742_v42  ;;  %v736_v24 = vadd.f32 1.4214138, %v728_v44  ;;  %v722_v12 = vadd.f32 -1.4531521, %v714_v18  ;;  %v1533_v7 = vmul.f32 %v1150_v36, %v700_v47  ;;  %v1160_v9 = vpop.eup %1159 }
 0x220   :  { %v749_v35 = vadd.f32 -0.28449672, %v741_v31  ;;  %v735_v58 = vadd.f32 1.4214138, %v727_v46  ;;  %v721_v55 = vadd.f32 -1.4531521, %v713_v52  ;;  %v1536_v27 = vpop.eup %1161 }
 0x221   :  { %v758_v15 = vmul.f32 %v750_v30, %v1505_v48  ;;  %v744_v26 = vmul.f32 %v736_v24, %v1511_v60  ;;  %v730_v32 = vmul.f32 %v722_v12, %v1523_v53  ;;  %v716_v33 = vmul.f32 1.0614054, %v1533_v7  ;;  %v1164_v44 = vpop.eup %1163 }
 0x222   :  { %v757_v2 = vmul.f32 %v749_v35, %v1507_v23  ;;  %v743_v29 = vmul.f32 %v735_v58, %v1513_v14  ;;  %v729_v38 = vmul.f32 %v721_v55, %v1525_v56  ;;  %v699_v42 = vsub.f32 2.0, %v691_v63  ;;  %v1546_v46 = vpop.eup %1165 }
 0x223   :  { %v766_v16 = vadd.f32 0.2548296, %v758_v15  ;;  %v752_v20 = vadd.f32 -0.28449672, %v744_v26  ;;  %v738_v31 = vadd.f32 1.4214138, %v730_v32 }
 0x224   :  { %v765_v21 = vadd.f32 0.2548296, %v757_v2  ;;  %v751_v22 = vadd.f32 -0.28449672, %v743_v29  ;;  %v737_v24 = vadd.f32 1.4214138, %v729_v38  ;;  %v1549_v51 = vmul.f32 %v1152_v34, %v699_v42 }
 0x225   :  { %v774_v28 = vmul.f32 %v766_v16, %v1505_v48  ;;  %v760_v59 = vmul.f32 %v752_v20, %v1511_v60  ;;  %v724_v48 = vadd.f32 -1.4531521, %v716_v33  ;;  %v746_v58 = vmul.f32 %v738_v31, %v1523_v53 }
 0x226   :  { %v773_v37 = vmul.f32 %v765_v21, %v1507_v23  ;;  %v759_v40 = vmul.f32 %v751_v22, %v1513_v14  ;;  %v745_v26 = vmul.f32 %v737_v24, %v1525_v56  ;;  %v715_v18 = vmul.f32 1.0614054, %v1549_v51 }
 0x227   :  { %v814_v25 = vmul.f32 %v1154_v62, %v774_v28  ;;  %v768_v36 = vadd.f32 0.2548296, %v760_v59  ;;  %v732_v57 = vmul.f32 %v724_v48, %v1533_v7  ;;  %v754_v34 = vadd.f32 -0.28449672, %v746_v58 }
 0x228   :  { %v813_v45 = vmul.f32 %v1156_v3, %v773_v37  ;;  %v767_v30 = vadd.f32 0.2548296, %v759_v40  ;;  %v723_v63 = vadd.f32 -1.4531521, %v715_v18  ;;  %v1168_v21 = vpop.eup %1167 }
 0x229   :  { %v822_v23 = vsub.f32 1.0, %v814_v25  ;;  %v776_v35 = vmul.f32 %v768_v36, %v1511_v60  ;;  %v740_v2 = vadd.f32 1.4214138, %v732_v57  ;;  %v753_v60 = vadd.f32 -0.28449672, %v745_v26 }
 0x22a   :  { %v821_v62 = vsub.f32 1.0, %v813_v45  ;;  %v775_v15 = vmul.f32 %v767_v30, %v1513_v14  ;;  %v762_v12 = vmul.f32 %v754_v34, %v1523_v53  ;;  %v731_v38 = vmul.f32 %v723_v63, %v1549_v51 }
 0x22b   :  { %v838_v47 = vsub.f32 0.0, %v822_v23  ;;  %v816_v3 = vmul.f32 %v1158_v8, %v776_v35  ;;  %v748_v14 = vmul.f32 %v740_v2, %v1533_v7  ;;  %v761_v28 = vmul.f32 %v753_v60, %v1525_v56 }
 0x22c   :  { %v837_v29 = vsub.f32 0.0, %v821_v62  ;;  %v815_v52 = vmul.f32 %v1160_v9, %v775_v15  ;;  %v770_v32 = vadd.f32 0.2548296, %v762_v12  ;;  %v641_v2 = vmul.f32 0.5, %v1475_v10 }
 0x22d   :  { %v846_v16 = vsel %vm830_vm12, %v822_v23, %v838_v47  ;;  %v824_v20 = vsub.f32 1.0, %v816_v3  ;;  %v756_v33 = vadd.f32 -0.28449672, %v748_v14  ;;  %v769_v40 = vadd.f32 0.2548296, %v761_v28 }
 0x22e   :  { %v854_v22 = vadd.f32 1.0, %v846_v16  ;;  %v845_v55 = vsel %vm829_vm13, %v821_v62, %v837_v29  ;;  %v823_v8 = vsub.f32 1.0, %v815_v52  ;;  %v778_v41 = vmul.f32 %v770_v32, %v1523_v53 }
 0x22f   :  { %v853_v59 = vadd.f32 1.0, %v845_v55  ;;  %v840_v9 = vsub.f32 0.0, %v824_v20  ;;  %v764_v36 = vmul.f32 %v756_v33, %v1533_v7  ;;  %v777_v45 = vmul.f32 %v769_v40, %v1525_v56 }
 0x230   :  { %v862_v39 = vmul.f32 %v854_v22, %v1486_v1  ;;  %v839_v37 = vsub.f32 0.0, %v823_v8  ;;  %v739_v1 = vadd.f32 1.4214138, %v731_v38  ;;  %v818_v23 = vmul.f32 %v1536_v27, %v778_v41 }
 0x231   :  { %v861_v42 = vmul.f32 %v853_v59, %v1488_v61  ;;  %v848_v25 = vsel %vm832_vm14, %v824_v20, %v840_v9  ;;  %v772_v35 = vadd.f32 0.2548296, %v764_v36  ;;  %v817_v49 = vmul.f32 %v1164_v44, %v777_v45 }
 0x232   :  { %v856_v31 = vadd.f32 1.0, %v848_v25  ;;  %v847_v48 = vsel %vm831_vm15, %v823_v8, %v839_v37  ;;  %v747_v58 = vmul.f32 %v739_v1, %v1549_v51  ;;  %v826_v57 = vsub.f32 1.0, %v818_v23 }
 0x233   :  { %v1088_v30 = vpack.c.bf16 %v862_v39, %v861_v42  ;;  %v855_v24 = vadd.f32 1.0, %v847_v48  ;;  %v780_v62 = vmul.f32 %v772_v35, %v1533_v7  ;;  %v825_v50 = vsub.f32 1.0, %v817_v49 }
 0x234   :  { %v864_v61 = vmul.f32 %v856_v31, %v1493_v0  ;;  %v755_v15 = vadd.f32 -0.28449672, %v747_v58  ;;  %v842_v26 = vsub.f32 0.0, %v826_v57  ;;  %v642_v7 = vmul.f32 0.5, %v1473_v11 }
 0x235   :  { %v863_v53 = vmul.f32 %v855_v24, %v1498_v17  ;;  %1089 = vmatpush3.bf16.msra.mxu0 %v1088_v30  ;;  %v820_v27 = vmul.f32 %v1546_v46, %v780_v62  ;;  %v841_v0 = vsub.f32 0.0, %v825_v50  ;;  %v644_v14 = vmul.f32 0.5, %v1484_v4  ;;  %v874_v4 = vpop.permute.xlu0 %873 }
 0x236   :  { %1090 = vmatprep.subr.bf16.mxu0 %v1170_v19  ;;  %v763_v44 = vmul.f32 %v755_v15, %v1549_v51  ;;  %v850_v18 = vsel %vm834_vm0, %v826_v57, %v842_v26  ;;  %v876_v28 = vlaneseq }
 0x237   :  { %v1091_v56 = vpack.c.bf16 %v864_v61, %v863_v53  ;;  %v828_v17 = vsub.f32 1.0, %v820_v27  ;;  %v858_v47 = vadd.f32 1.0, %v850_v18  ;;  %v849_v3 = vsel %vm833_vm1, %v825_v50, %v841_v0 }
 0x238   :  { %v771_v34 = vadd.f32 0.2548296, %v763_v44  ;;  %v857_v46 = vadd.f32 1.0, %v849_v3 }
 0x239   :  { %1092 = vmatpush3.bf16.msra.mxu0 %v1091_v56  ;;  %v844_v29 = vsub.f32 0.0, %v828_v17  ;;  %v866_v5 = vmul.f32 %v858_v47, %v642_v7 }
 0x23a   :  { %1093 = vmatprep.subr.bf16.mxu0 %v1170_v19  ;;  %v779_v52 = vmul.f32 %v771_v34, %v1549_v51  ;;  %v865_v60 = vmul.f32 %v857_v46, %v641_v2  ;;  %v643_v51 = vmul.f32 0.5, %v1491_v6 }
 0x23b   :  { %v852_v43 = vsel %vm836_vm3, %v828_v17, %v844_v29 }
 0x23c   :  { %v819_v63 = vmul.f32 %v1168_v21, %v779_v52  ;;  %v1094_v16 = vpack.c.bf16 %v866_v5, %v865_v60  ;;  %v860_v11 = vadd.f32 1.0, %v852_v43  ;;  %v869_v21 = vld [vmem:[%s1607_s5] sm:$0x1] }
 0x23e   :  { %v827_v20 = vsub.f32 1.0, %v819_v63  ;;  %1095 = vmatpush3.bf16.msra.mxu0 %v1094_v16  ;;  %v868_v22 = vmul.f32 %v860_v11, %v644_v14 }
 0x23f   :  { %1096 = vmatprep.subr.bf16.mxu0 %v1170_v19  ;;  %v877_v19 = vshrl.u32 %v876_v28, 7 }
 0x240   :  { %v843_v12 = vsub.f32 0.0, %v827_v20 }
 0x241   :  { %v878_v59 = vsub.s32 0, %v877_v19 }
 0x242   :  { %v851_v10 = vsel %vm835_vm4, %v827_v20, %v843_v12 }
 0x243   :  { %v859_v55 = vadd.f32 1.0, %v851_v10  ;;  %v879_v9 = vrot.slane %v874_v4, %v878_v59 }
 0x245   :  { %v867_v8 = vmul.f32 %v859_v55, %v643_v51 }
 0x247   :  { %v1097_v54 = vpack.c.bf16 %v868_v22, %v867_v8 }
 0x249   :  { %1098 = vmatpush3.bf16.msra.mxu0 %v1097_v54 }
 0x24c   :  { %1069 = vmatmul.mubr.msk.f32.vlgmr.msra.gmra.mrb[8].mxu0 %vm507_vm2, %v869_v21 }
 0x31f   :  { %v949_v13 = vpop.f32.mrb[8].mxu0 }
 0x320   :  { %v950_v32 = vadd.f32 %v949_v13, %v879_v9  ;;  %v1070_v33 = vpop.f32.mrb[9].mxu0 }
 0x322   :  { %953 = vst [vmem:[%s1608_s7] sm:$0x1] %v950_v32 }

</bundles_post_ra>
